<compile_context>
chip_gen: v7x
topology: tpu7x:2x2x1
jax: 0.10.0
libtpu: 0.0.40
codegen_flags: <defaults>
</compile_context>

<pallas_src>
import functools

import jax
import jax.numpy as jnp
from jax.experimental import pallas as pl
from jax.experimental.pallas import tpu as pltpu


# ----------------------------- Pallas kernel --------------------------------
def _convblock_kernel(x_ref, w_ref, scale_ref, shift_ref, o_ref, *, block_n, H, Kin, Nout):
    # x_ref:     (block_n, H+2, (W+2)*Cin)  bf16 padded NHWC slabs
    # w_ref:     (3, (W+2)*Cin, W*Cout)     bf16 banded per-dy weights (unscaled)
    # scale_ref: (1, W*Cout)                f32 per-channel BN scale, tiled along W
    # shift_ref: (1, W*Cout)                f32 per-channel shift (bias+BN), tiled along W
    # o_ref:     (block_n, H, W*Cout)       bf16 output, lane-dense last dim
    acc = None
    for dy in range(3):   # statically unrolled: 3 lane-aligned MXU matmuls, pure dot chain
        lhs = x_ref[:, dy:dy + H, :].reshape(block_n * H, Kin)
        d = jnp.dot(lhs, w_ref[dy], preferred_element_type=jnp.float32)
        acc = d if acc is None else acc + d
    # f32 epilogue: BN scale on the accumulator, shift, ReLU (Dropout2d = identity in eval).
    y = acc * scale_ref[...] + shift_ref[...]
    y = jnp.maximum(y, 0.0)
    o_ref[...] = y.reshape(block_n, H, Nout).astype(o_ref.dtype)


def _pick_block_n(N):
    # Grow M = block_n*H toward 128-256 MXU rows while keeping >= 2 grid steps
    # (so v7x's two TensorCores both get a "parallel" step).
    for b in (16, 8, 4, 2):
        if N % b == 0 and N // b >= 2:
            return b
    return 1


def convblock_pallas(x3d, wband, scale_row, shift_row, *, H, W, Cin, Cout):
    N = x3d.shape[0]
    Kin, Nout = (W + 2) * Cin, W * Cout
    block_n = _pick_block_n(N)
    assert N % block_n == 0
    grid_n = N // block_n

    kernel = functools.partial(_convblock_kernel, block_n=block_n, H=H, Kin=Kin, Nout=Nout)

    # Advisory cost estimate: effective conv flops (not band-padded MXU flops).
    flops = 2 * N * H * W * 9 * Cin * Cout
    bytes_accessed = (N * (H + 2) * Kin * 2      # bf16 padded input
                      + 3 * Kin * Nout * 2       # bf16 banded weights
                      + 2 * Nout * 4             # f32 scale + shift rows
                      + N * H * Nout * 2)        # bf16 output

    return pl.pallas_call(
        kernel,
        out_shape=jax.ShapeDtypeStruct((N, H, Nout), jnp.bfloat16),
        grid=(grid_n,),
        in_specs=[
            pl.BlockSpec((block_n, H + 2, Kin), lambda n: (n, 0, 0)),
            pl.BlockSpec((3, Kin, Nout), lambda n: (0, 0, 0)),   # VMEM-resident across steps
            pl.BlockSpec((1, Nout), lambda n: (0, 0)),           # VMEM-resident
            pl.BlockSpec((1, Nout), lambda n: (0, 0)),           # VMEM-resident
        ],
        out_specs=pl.BlockSpec((block_n, H, Nout), lambda n: (n, 0, 0)),
        compiler_params=pltpu.CompilerParams(dimension_semantics=("parallel",)),
        cost_estimate=pl.CostEstimate(flops=flops, transcendentals=0,
                                      bytes_accessed=bytes_accessed),
    )(x3d, wband, scale_row, shift_row)


# --------------------------- one-time weight prep -----------------------------
def prepare_conv_block(params, W, eps=1e-5):
    """Hoisted out of the per-call path: banded-weight expansion + BN folding + bf16 casts."""
    w, b = params["conv_w"], params["conv_b"]
    gamma, beta = params["bn_w"], params["bn_b"]
    mean, var = params["bn_mean"], params["bn_var"]
    Cout, Cin = w.shape[0], w.shape[1]

    scale = gamma / jnp.sqrt(var + eps)            # [Cout] BN scale (applied in f32 epilogue)
    shift = (b - mean) * scale + beta              # [Cout] folded conv-bias + BN shift

    # conv weight [Cout, Cin, 3, 3] -> per-tap [dy, dx, Cin, Cout] (NOT scaled; stays bf16-safe)
    w_taps = jnp.transpose(w, (2, 3, 1, 0))
    # Band selector: sel[dx, p, w] = 1 iff p == w + dx  (p in [0, W+2), w in [0, W)).
    sel = jnp.stack([jnp.eye(W + 2, W, k=-dx, dtype=w.dtype) for dx in range(3)])
    # Banded weights: wband[dy, p*Cin+ci, w*Cout+c] = w[c, ci, dy, p-w] inside the band, else 0.
    wband = jnp.einsum('xpw,yxic->ypiwc', sel, w_taps).reshape(3, (W + 2) * Cin, W * Cout)

    return {
        "wband": wband.astype(jnp.bfloat16),
        "scale_row": jnp.tile(scale, W).reshape(1, W * Cout).astype(jnp.float32),
        "shift_row": jnp.tile(shift, W).reshape(1, W * Cout).astype(jnp.float32),
        "cout": int(Cout),
    }


# ------------------------------ forward (hot path) ----------------------------
def conv_block_forward_nhwc(x_nhwc, prepped):
    """ConvBlock forward (eval mode). NHWC float in -> NHWC bf16 out. Pad + 1 Pallas call."""
    N, H, W, Cin = x_nhwc.shape
    Cout = prepped["cout"]
    xp = jnp.pad(x_nhwc.astype(jnp.bfloat16), ((0, 0), (1, 1), (1, 1), (0, 0)))
    x3d = xp.reshape(N, H + 2, (W + 2) * Cin)
    out3d = convblock_pallas(x3d, prepped["wband"], prepped["scale_row"], prepped["shift_row"],
                             H=H, W=W, Cin=Cin, Cout=Cout)
    return out3d.reshape(N, H, W, Cout)


def conv_block_forward_nchw(x_nchw, prepped):
    """Thin NCHW adapter (matches the PyTorch layout for testing)."""
    x_nhwc = jnp.transpose(x_nchw, (0, 2, 3, 1))
    out_nhwc = conv_block_forward_nhwc(x_nhwc, prepped)
    return jnp.transpose(out_nhwc, (0, 3, 1, 2)).astype(jnp.float32)


# ------------------------------ reference ------------------------------------
def conv_block_reference(x_nchw, params, eps=1e-5):
    w, b = params["conv_w"], params["conv_b"]
    gamma, beta = params["bn_w"], params["bn_b"]
    mean, var = params["bn_mean"], params["bn_var"]
    y = jax.lax.conv_general_dilated(
        x_nchw, w, window_strides=(1, 1), padding=((1, 1), (1, 1)),
        dimension_numbers=("NCHW", "OIHW", "NCHW"))
    y = y + b[None, :, None, None]
    y = (y - mean[None, :, None, None]) / jnp.sqrt(var[None, :, None, None] + eps)
    y = y * gamma[None, :, None, None] + beta[None, :, None, None]
    return jnp.maximum(y, 0.0)


# --------------------------------- main ---------------------------------------
if __name__ == "__main__":
    key = jax.random.PRNGKey(0)
    N, Cin, H, W = 2, 4, 16, 16
    Cout = 8

    k_x, k_w, k_b, k_g, k_bt = jax.random.split(key, 5)
    x = jax.random.normal(k_x, (N, Cin, H, W), dtype=jnp.float32)

    # Deterministic parameter init (shapes match nn.Conv2d(4, 8, 3) + BatchNorm2d(8)).
    fan_in = Cin * 3 * 3
    bound = 1.0 / (fan_in ** 0.5)
    params = {
        "conv_w": jax.random.uniform(k_w, (Cout, Cin, 3, 3), jnp.float32, -bound, bound),
        "conv_b": jax.random.uniform(k_b, (Cout,), jnp.float32, -bound, bound),
        "bn_w": 1.0 + 0.1 * jax.random.normal(k_g, (Cout,), jnp.float32),
        "bn_b": 0.1 * jax.random.normal(k_bt, (Cout,), jnp.float32),
        "bn_mean": jnp.zeros((Cout,), jnp.float32),
        "bn_var": jnp.ones((Cout,), jnp.float32),
    }

    prepped = prepare_conv_block(params, W=W)     # one-time prep, off the hot path
    out = jax.block_until_ready(conv_block_forward_nchw(x, prepped))
    ref = conv_block_reference(x, params)

    assert out.shape == (N, Cout, H, W), out.shape
    # Tolerance accounts for bf16 inputs/weights/output (f32 accumulation + f32 BN epilogue).
    assert jnp.allclose(out, ref, atol=5e-2, rtol=5e-2), float(jnp.max(jnp.abs(out - ref)))

    print("KERNEL_OK")
</pallas_src>

<mosaic_0001>
module attributes {stable_mosaic.version = 11 : i64} {
  func.func @_convblock_kernel(%arg0: i32, %arg1: memref<1x18x72xbf16, #tpu.memory_space<vmem>>, %arg2: memref<3x72x128xbf16, #tpu.memory_space<vmem>>, %arg3: memref<1x128xf32, #tpu.memory_space<vmem>>, %arg4: memref<1x128xf32, #tpu.memory_space<vmem>>, %arg5: memref<1x16x128xbf16, #tpu.memory_space<vmem>>) attributes {dimension_semantics = [#tpu.dimension_semantics<parallel>], iteration_bounds = array<i64: 2>, scalar_prefetch = 0 : i64, scratch_operands = 0 : i64, tpu.core_type = #tpu.core_type<tc>, window_params = [{transform_indices = @transform_0, window_bounds = array<i64: 1, 18, 72>}, {pipeline_mode = #tpu.pipeline_mode<synchronous>, transform_indices = @transform_1, window_bounds = array<i64: 3, 72, 128>}, {pipeline_mode = #tpu.pipeline_mode<synchronous>, transform_indices = @transform_2, window_bounds = array<i64: 1, 128>}, {pipeline_mode = #tpu.pipeline_mode<synchronous>, transform_indices = @transform_3, window_bounds = array<i64: 1, 128>}, {transform_indices = @transform_4, window_bounds = array<i64: 1, 16, 128>}]} {
    %c0 = arith.constant 0 : index
    %c0_0 = arith.constant 0 : index
    %c0_1 = arith.constant 0 : index
    %0 = vector.load %arg1[%c0, %c0_0, %c0_1] : memref<1x18x72xbf16, #tpu.memory_space<vmem>>, vector<1x16x72xbf16>
    %1 = vector.shape_cast %0 : vector<1x16x72xbf16> to vector<16x72xbf16>
    %c0_2 = arith.constant 0 : index
    %c0_3 = arith.constant 0 : index
    %c0_4 = arith.constant 0 : index
    %2 = vector.load %arg2[%c0_2, %c0_3, %c0_4] : memref<3x72x128xbf16, #tpu.memory_space<vmem>>, vector<1x72x128xbf16>
    %3 = vector.shape_cast %2 : vector<1x72x128xbf16> to vector<72x128xbf16>
    %cst = arith.constant dense<0.000000e+00> : vector<16x128xf32>
    %4 = tpu.matmul %1, %3, %cst {dimension_numbers = #tpu.dot_dimension_numbers<[1], [0], [0], [1], [0, 0, 1, 1], [], []>} : vector<16x72xbf16>, vector<72x128xbf16>, vector<16x128xf32> -> vector<16x128xf32>
    %c0_5 = arith.constant 0 : index
    %c1 = arith.constant 1 : index
    %c0_6 = arith.constant 0 : index
    %5 = vector.load %arg1[%c0_5, %c1, %c0_6] : memref<1x18x72xbf16, #tpu.memory_space<vmem>>, vector<1x16x72xbf16>
    %6 = vector.shape_cast %5 : vector<1x16x72xbf16> to vector<16x72xbf16>
    %c1_7 = arith.constant 1 : index
    %c0_8 = arith.constant 0 : index
    %c0_9 = arith.constant 0 : index
    %7 = vector.load %arg2[%c1_7, %c0_8, %c0_9] : memref<3x72x128xbf16, #tpu.memory_space<vmem>>, vector<1x72x128xbf16>
    %8 = vector.shape_cast %7 : vector<1x72x128xbf16> to vector<72x128xbf16>
    %cst_10 = arith.constant dense<0.000000e+00> : vector<16x128xf32>
    %9 = tpu.matmul %6, %8, %cst_10 {dimension_numbers = #tpu.dot_dimension_numbers<[1], [0], [0], [1], [0, 0, 1, 1], [], []>} : vector<16x72xbf16>, vector<72x128xbf16>, vector<16x128xf32> -> vector<16x128xf32>
    %10 = arith.addf %4, %9 : vector<16x128xf32>
    %c0_11 = arith.constant 0 : index
    %c2 = arith.constant 2 : index
    %c0_12 = arith.constant 0 : index
    %11 = vector.load %arg1[%c0_11, %c2, %c0_12] : memref<1x18x72xbf16, #tpu.memory_space<vmem>>, vector<1x16x72xbf16>
    %12 = vector.shape_cast %11 : vector<1x16x72xbf16> to vector<16x72xbf16>
    %c2_13 = arith.constant 2 : index
    %c0_14 = arith.constant 0 : index
    %c0_15 = arith.constant 0 : index
    %13 = vector.load %arg2[%c2_13, %c0_14, %c0_15] : memref<3x72x128xbf16, #tpu.memory_space<vmem>>, vector<1x72x128xbf16>
    %14 = vector.shape_cast %13 : vector<1x72x128xbf16> to vector<72x128xbf16>
    %cst_16 = arith.constant dense<0.000000e+00> : vector<16x128xf32>
    %15 = tpu.matmul %12, %14, %cst_16 {dimension_numbers = #tpu.dot_dimension_numbers<[1], [0], [0], [1], [0, 0, 1, 1], [], []>} : vector<16x72xbf16>, vector<72x128xbf16>, vector<16x128xf32> -> vector<16x128xf32>
    %16 = arith.addf %10, %15 : vector<16x128xf32>
    %c0_17 = arith.constant 0 : index
    %c0_18 = arith.constant 0 : index
    %17 = vector.load %arg3[%c0_17, %c0_18] : memref<1x128xf32, #tpu.memory_space<vmem>>, vector<1x128xf32>
    %18 = vector.broadcast %17 : vector<1x128xf32> to vector<16x128xf32>
    %19 = arith.mulf %16, %18 : vector<16x128xf32>
    %c0_19 = arith.constant 0 : index
    %c0_20 = arith.constant 0 : index
    %20 = vector.load %arg4[%c0_19, %c0_20] : memref<1x128xf32, #tpu.memory_space<vmem>>, vector<1x128xf32>
    %21 = vector.broadcast %20 : vector<1x128xf32> to vector<16x128xf32>
    %22 = arith.addf %19, %21 : vector<16x128xf32>
    %cst_21 = arith.constant 0.000000e+00 : f32
    %23 = vector.broadcast %cst_21 : f32 to vector<16x128xf32>
    %24 = arith.maximumf %22, %23 : vector<16x128xf32>
    %25 = vector.shape_cast %24 : vector<16x128xf32> to vector<1x16x128xf32>
    %26 = arith.truncf %25 : vector<1x16x128xf32> to vector<1x16x128xbf16>
    %c0_22 = arith.constant 0 : index
    %c0_23 = arith.constant 0 : index
    %c0_24 = arith.constant 0 : index
    %27 = vector.load %arg5[%c0_22, %c0_23, %c0_24] : memref<1x16x128xbf16, #tpu.memory_space<vmem>>, vector<1x16x128xbf16>
    tpu.vector_store %arg5[%c0_22, %c0_23, %c0_24], %26 {strides = array<i32>} : memref<1x16x128xbf16, #tpu.memory_space<vmem>>, vector<1x16x128xbf16>,
    return
  }
  func.func @transform_0(%arg0: i32) -> (i32, i32, i32) {
    %c0_i32 = arith.constant 0 : i32
    %c0_i32_0 = arith.constant 0 : i32
    %c0_i32_1 = arith.constant 0 : i32
    return %arg0, %c0_i32, %c0_i32_0 : i32, i32, i32
  }
  func.func @transform_1(%arg0: i32) -> (i32, i32, i32) {
    %c0_i32 = arith.constant 0 : i32
    %c0_i32_0 = arith.constant 0 : i32
    %c0_i32_1 = arith.constant 0 : i32
    %c0_i32_2 = arith.constant 0 : i32
    return %c0_i32, %c0_i32_0, %c0_i32_1 : i32, i32, i32
  }
  func.func @transform_2(%arg0: i32) -> (i32, i32) {
    %c0_i32 = arith.constant 0 : i32
    %c0_i32_0 = arith.constant 0 : i32
    %c0_i32_1 = arith.constant 0 : i32
    return %c0_i32, %c0_i32_0 : i32, i32
  }
  func.func @transform_3(%arg0: i32) -> (i32, i32) {
    %c0_i32 = arith.constant 0 : i32
    %c0_i32_0 = arith.constant 0 : i32
    %c0_i32_1 = arith.constant 0 : i32
    return %c0_i32, %c0_i32_0 : i32, i32
  }
  func.func @transform_4(%arg0: i32) -> (i32, i32, i32) {
    %c0_i32 = arith.constant 0 : i32
    %c0_i32_0 = arith.constant 0 : i32
    %c0_i32_1 = arith.constant 0 : i32
    return %arg0, %c0_i32, %c0_i32_0 : i32, i32, i32
  }
}

</mosaic_0001>

<bundles_post_ra>
// kernel: tpu_custom_call.1
= control target key start
LH: loop header
LB: loop body
LE: loop exit
PB: predicated region body
PF: predicated region fallthrough
CT: control target
= control target key end

     0   :  { %9 = vsyncpa [#allocation3], 0  ;;  %s1109_s0 = inlined_call_operand.vmem [shape: bf16[2,18,72], index: 0, kind: input, shape index: {}]   ;;  %s1110_s1 = inlined_call_operand.hbm [shape: bf16[3,72,128], index: 1, kind: input, shape index: {}]   ;;  %s1111_s2 = inlined_call_operand.vmem [shape: f32[1,128], index: 2, kind: input, shape index: {}]   ;;  %s1112_s3 = inlined_call_operand.vmem [shape: f32[1,128], index: 3, kind: input, shape index: {}]   ;;  %s1113_s4 = inlined_call_operand.hbm [shape: bf16[2,16,128], index: 4, kind: output, shape index: {}]  }
   0x1   :  { %10 = vsyncpa [#allocation4], 0 }
   0x2   :  { %12 = vsyncpa [#allocation4 + $0x1], 0  ;;  %s932_s15 = smov 0   ;;  %s934_s16 = smov 0  }
   0x3   :  { %s936_s17 = smov 0   ;;  %s938_s18 = smov 0  }
   0x4 LB: > { %s953_s19 = sadd.s32 4294967295, %s897_s18   ;;  %s616_s20 = sadd.s32 4294967294, %s897_s18   ;;  %s897_s18 = sphi %s938_s18, %s1129_s18   ;;  %s893_s17 = sphi %s936_s17, %s1128_s17   ;;  %s889_s16 = sphi %s934_s16, %s1127_s16   ;;  %s885_s15 = sphi %s932_s15, %s1126_s15  }
   0x5   : > { %s957_s21 = sadd.s32 1, %s897_s18   ;;  %s114_s22 = sadd.s32 1, %s893_s17 }
   0x6   : > { %s111_s23 = ssub.s32 %s897_s18, %s957_s21  ;;  %p124_p0 = scmp.ne.s32.totalorder %s893_s17, %s889_s16 }
   0x7   : > { %p112_p1 = scmp.eq.s32.totalorder %s111_s23, 0  ;;  %p125_p2 = scmp.eq.s32.totalorder %s953_s19, 1 }
   0x8   : > { %p130_p3 = scmp.ne.s32.totalorder %s889_s16, %s885_s15  ;;  %p131_p4 = scmp.eq.s32.totalorder %s616_s20, 1 }
   0x9   : > { %s968_s24 = scalar_select %p112_p1, %s893_s17, %s114_s22  }
   0xa   : > { %p970_p5 = por %p125_p2, %p124_p0  ;;  %p974_p6 = por %p131_p4, %p130_p3 }
   0xb   : > { %p617_p7 = scmp.ge.s32.totalorder %s897_s18, 1  ;;  %p138_p8 = scmp.lt.s32.totalorder %s897_s18, 3 }
   0xc   : > { %s1117_s25 = scalar_select %p970_p5, 1, 0 }
   0xd   : > { %s1118_s26 = scalar_select %p974_p6, 1, 0 }
   0xe   : > { %p1114_p9 = scmp.eq.s32.totalorder %s953_s19, 0  ;;  %p981_p10 = pnand %p617_p7, %p138_p8 }
   0xf   : > { %s899_s28 = smov [#allocation2]   ;;  %s803_s7 = scalar_lea.hbm %s1110_s1, 1728 }
  0x10   : > { %s1119_s27 = scalar_select %p981_p10, 1, 0 }
  0x11   : > { %s150_s29 = sshll.u32 %s899_s28, 4  ;;  %p735_p11 = pneg %p981_p10  ;;  %s151_s29 = int_to_ptr.vmem [resolvable:$true] %s150_s29 }
  0x12   : > { %p804_p13 = scmp.ne.s32.totalorder %s1110_s1, %s803_s7  ;;  %p810_p3 = scmp.lt.u32.totalorder %s803_s7, %s1110_s1 }
  0x13   : > { %p989_p12 = pnand %p1114_p9, %p735_p11 }
  0x15   : > { %p805_p0 = pneg %p989_p12 }
  0x17   : > { %p806_p1 = pnand %p805_p0, %p804_p13 }
  0x19   : > { %p807_p2 = pneg %p806_p1 }
  0x1b   : > { %p812_p4 = pnand %p810_p3, %p807_p2 }
  0x1d   : > { %815 = shalt.err (!%p812_p4)
}
  0x1e   : > { %s816_s12 = scalar_lea.vmem %s151_s29, 1728  ;;  %p824_p9 = scmp.lt.s32.totalorder %s151_s29, %s151_s29 }
  0x1f   : > { %p817_p7 = scmp.ne.s32.totalorder %s151_s29, %s816_s12  ;;  %p825_p6 = scmp.lt.s32.totalorder %s816_s12, %s816_s12 }
  0x21   : > { %p819_p8 = pnand %p817_p7, %p805_p0  ;;  %p826_p5 = por %p825_p6, %p824_p9 }
  0x23   : > { %p820_p11 = pneg %p819_p8 }
  0x25   : > { %p827_p10 = pnand %p826_p5, %p820_p11 }
  0x27   : > { %830 = shalt.err (!%p827_p10)
}
  0x28   : > { %s900_s13 = smov 64   ;;  %s901_s14 = smov 4  }
  0x29   : > { %738 = dma.hbm_to_vmem [thread:$0]  (!%p989_p12), %s1110_s1, 1728, %s151_s29, [#allocation3], %s900_s13, %s900_s13, %s901_s14  }
  0x2a   : > { %p1121_p13 = scmp.ne.s32.totalorder %s1119_s27, 0 }
  0x2b   : > { %p1122_p1 = scmp.eq.s32.totalorder (!%p1121_p13), %s953_s19, 0 }
  0x2c   : > { %180 = sbr.rel (%p1121_p13) target bundleno = 333 (0x14d), region = 36 }
  0x33   : > { %876 = dma.done.wait (%p1122_p1), [#allocation3], 1728   ;;  %p1123_p0 = pmov %p1122_p1 }
  0x34   : > { %p206_p5 = scmp.lt.s32.totalorder %s953_s19, 1  ;;  %v902_v0 = vmov 0.0   ;;  %vm903_vm0 = vmmov 0   ;;  %v785_v1 = vld [vmem:[#allocation2] sm:$0xff]   ;;  %v786_v2 = vld [vmem:[#allocation2 + $0x8] sm:$0xff]   ;;  %v787_v4 = vld [vmem:[#allocation2 + $0x10] sm:$0xff]  }
  0x35   : > { %878 = vsyncadd (%p1123_p0), [#allocation3], 4294965568  ;;  %694 = vmatprep.subr.bf16.mxu0 %v902_v0  ;;  %680 = vmatprep.subr.bf16.mxu1 %v902_v0  ;;  %v790_v3 = vld [vmem:[#allocation2 + $0x24] sm:$0xff]   ;;  %v794_v7 = vld [vmem:[#allocation2 + $0x2c] sm:$0xff]   ;;  %vm286_vm1 = vcmask 1043456   ;;  %vm282_vm2 = vcmask 588800  }
  0x36   : > { %704 = vmatprep.mubr.msk.bf16.mxu0 %vm903_vm0, %v902_v0  ;;  %s207_s23 = scalar_select %p206_p5, %s953_s19, 1  ;;  %690 = vmatprep.mubr.msk.bf16.mxu1 %vm903_vm0, %v902_v0  ;;  %v788_v8 = vld [vmem:[#allocation2 + $0x18] sm:$0xff]   ;;  %v789_v10 = vld [vmem:[#allocation2 + $0x20] ss:$0 sps:$4 sm:$0xff]   ;;  %v800_v18 = vld [vmem:[#allocation2 + $0x44] ss:$0 sps:$4 sm:$0xff]  }
  0x37   : > { %695 = vmatpush3.bf16.msra.mxu0 %v785_v1  ;;  %681 = vmatpush3.bf16.msra.mxu1 %v790_v3  ;;  %v796_v11 = vld [vmem:[#allocation2 + $0x34] sm:$0xff]   ;;  %v361_v13 = vsel %vm286_vm1, %v789_v10, 0  ;;  %v798_v14 = vld [vmem:[#allocation2 + $0x3c] sm:$0xff]   ;;  %v793_v20 = vld [vmem:[#allocation2 + $0x48] sm:$0xff]   ;;  %v288_v23 = vsel %vm286_vm1, %v800_v18, 0  ;;  %vm418_vm4 = vcmask 1046528  }
  0x38   : > { %s728_s27 = smul.u32 12, %s207_s23  ;;  %696 = vmatprep.subr.bf16.mxu0 %v902_v0  ;;  %682 = vmatprep.subr.bf16.mxu1 %v902_v0  ;;  %vm242_vm3 = vsmask.f32 7424  ;;  %v795_v24 = vld [vmem:[#allocation2 + $0x50] sm:$0xff]   ;;  %v797_v26 = vld [vmem:[#allocation2 + $0x58] sm:$0xff]   ;;  %v799_v29 = vld [vmem:[#allocation2 + $0x60] sm:$0xff]  }
  0x39   : > { %v802_v30 = vld [vmem:[#allocation2 + $0x68] ss:$0 sps:$4 sm:$0xff]   ;;  %s203_s5 = sand.u32 1, %s889_s16   ;;  %s656_s11 = sshll.u32 %s953_s19, 7 }
  0x3a   : > { %s1027_s30 = scalar_lea.vmem %s1109_s0, %s728_s27  ;;  %v453_v33 = vsel %vm286_vm1, %v802_v30, 0  ;;  %v645_v40 = vld [vmem:[%s1111_s2] ss:$0 sm:$0xff]  ;;  %s622_s8 = sshll.u32 %s203_s5, 3 }
  0x3b   : > { %697 = vmatpush3.bf16.msra.mxu0 %v786_v2  ;;  %v212_v5 = vld [vmem:[%s1027_s30] sm:$0xf]  ;;  %v213_v6 = vld [vmem:[%s1027_s30 + $0x4] sm:$0xf]  ;;  %683 = vmatpush3.bf16.msra.mxu1 %v794_v7  ;;  %s205_s12 = scalar_lea.vmem [#allocation5], %s622_s8  ;;  %s1064_s22 = scalar_lea.hbm %s1113_s4, %s656_s11 }
  0x3c   : > { %698 = vmatprep.subr.bf16.mxu0 %v902_v0  ;;  %v624_v9 = vcombine.low %v212_v5, %v213_v6  ;;  %684 = vmatprep.subr.bf16.mxu1 %v902_v0  ;;  %v801_v15 = vld [vmem:[%s1027_s30 + $0x8] ss:$0 sps:$4 sm:$0x11]   ;;  %v404_v27 = vld [vmem:[%s1027_s30] sm:$0xe]  ;;  %s542_s13 = sshll.u32 %s205_s12, 4  ;;  %s1066_s13 = int_to_ptr.vmem [resolvable:$true] %s542_s13 }
  0x3d   : > { %v251_v19 = vshll.u32 %v801_v15, 16  ;;  %v638_v28 = vcombine.low %v404_v27, %v213_v6  ;;  %v420_v32 = vrot.slane %v801_v15, 1  ;;  %v646_v43 = vld [vmem:[%s1112_s3] ss:$0 sm:$0xff]  ;;  %s1068_s23 = scalar_lea.sflag [#allocation4], %s203_s5  ;;  %s831_s27 = scalar_lea.vmem %s1066_s13, 128 }
  0x3e   : > { %v246_v12 = vshll.u32 %v624_v9, 16  ;;  %v244_v16 = vshrl.u32 %v624_v9, 16  ;;  %p832_p6 = scmp.ne.s32.totalorder %s1066_s13, %s831_s27  ;;  %p1124_p9 = scmp.ne.s32.totalorder %s1117_s25, 0 }
  0x3f   : > { %699 = vmatpush3.bf16.msra.mxu0 %v787_v4  ;;  %685 = vmatpush3.bf16.msra.mxu1 %v796_v11  ;;  %v253_v22 = vrot.slane %v251_v19, 1  ;;  %v419_v31 = vrot.slane %v638_v28, 1  ;;  %s904_s19 = smov [#allocation5]  }
  0x40   : > { %700 = vmatprep.subr.bf16.mxu0 %v902_v0  ;;  %v248_v17 = vrot.slane %v246_v12, 1  ;;  %686 = vmatprep.subr.bf16.mxu1 %v902_v0  ;;  %p833_p10 = pnand %p832_p6, %p1124_p9  ;;  %s835_s28 = sshll.u32 %s904_s19, 4  ;;  %s836_s28 = int_to_ptr.vmem [resolvable:$false] %s835_s28 }
  0x41   : > { %v421_v34 = vsel %vm418_vm4, %v419_v31, %v420_v32  ;;  %s837_s29 = scalar_lea.vmem %s836_s28, 256  ;;  %p838_p2 = scmp.lt.s32.totalorder %s1066_s13, %s836_s28 }
  0x42   : > { %v249_v21 = vor.u32 %v248_v17, %v244_v16  ;;  %p834_p12 = pneg %p833_p10  ;;  %p839_p3 = scmp.lt.s32.totalorder %s837_s29, %s831_s27 }
  0x43   : > { %701 = vmatpush3.bf16.msra.mxu0 %v788_v8  ;;  %687 = vmatpush3.bf16.msra.mxu1 %v798_v14 }
  0x44   : > { %702 = vmatprep.subr.bf16.mxu0 %v902_v0  ;;  %688 = vmatprep.subr.bf16.mxu1 %v902_v0  ;;  %v254_v25 = vsel %vm242_vm3, %v249_v21, %v253_v22  ;;  %p840_p4 = por %p839_p3, %p838_p2 }
  0x46   : > { %p841_p7 = pnand %p840_p4, %p834_p12 }
  0x47   : > { %703 = vmatpush3.bf16.msra.mxu0 %v361_v13  ;;  %689 = vmatpush3.bf16.msra.mxu1 %v288_v23 }
  0x48   : > { %708 = vmatprep.subr.bf16.mxu0 %v902_v0 }
  0x4a   : > { %705 = vmatmul.mubr.msk.bf16.vlgmr.msra.gmra.mrb[0].mxu0 %vm282_vm2, %v624_v9  ;;  %691 = vmatmul.mubr.msk.bf16.vlgmr.msra.gmra.mrb[0].mxu1 %vm282_vm2, %v254_v25 }
  0x4b   : > { %709 = vmatpush3.bf16.msra.mxu0 %v793_v20  ;;  %718 = vmatprep.mubr.msk.bf16.mxu0 %vm903_vm0, %v902_v0 }
  0x4c   : > { %710 = vmatprep.subr.bf16.mxu0 %v902_v0 }
  0x4f   : > { %711 = vmatpush3.bf16.msra.mxu0 %v795_v24 }
  0x50   : > { %712 = vmatprep.subr.bf16.mxu0 %v902_v0 }
  0x53   : > { %713 = vmatpush3.bf16.msra.mxu0 %v797_v26 }
  0x54   : > { %714 = vmatprep.subr.bf16.mxu0 %v902_v0 }
  0x57   : > { %715 = vmatpush3.bf16.msra.mxu0 %v799_v29 }
  0x58   : > { %716 = vmatprep.subr.bf16.mxu0 %v902_v0 }
  0x5b   : > { %717 = vmatpush3.bf16.msra.mxu0 %v453_v33 }
  0x5e   : > { %719 = vmatmul.mubr.msk.bf16.vlgmr.msra.gmra.mrb[0].mxu0 %vm282_vm2, %v421_v34 }
 0x11d   : > { %v324_v35 = vpop.f32.mrb[0].mxu1 }
 0x11e   : > { %v692_v36 = vpop.f32.mrb[1].mxu1 }
 0x11f   : > { %v327_v37 = vpop.f32.mrb[2].mxu1 }
 0x120   : > { %v693_v38 = vpop.f32.mrb[3].mxu1 }
 0x131   : > { %v489_v39 = vpop.f32.mrb[0].mxu0 }
 0x132   : > { %v722_v41 = vadd.f32 %v489_v39, %v324_v35  ;;  %v720_v42 = vpop.f32.mrb[1].mxu0 }
 0x133   : > { %v492_v44 = vpop.f32.mrb[2].mxu0 }
 0x134   : > { %v505_v45 = vmul.f32 %v722_v41, %v645_v40  ;;  %v723_v46 = vadd.f32 %v492_v44, %v327_v37  ;;  %v721_v47 = vpop.f32.mrb[3].mxu0 }
 0x136   : > { %v514_v48 = vadd.f32 %v646_v43, %v505_v45  ;;  %v506_v49 = vmul.f32 %v723_v46, %v645_v40 }
 0x138   : > { %v515_v50 = vadd.f32 %v646_v43, %v506_v49  ;;  %v516_v51 = vmax.f32 %v514_v48, 0.0 }
 0x13a   : > { %v517_v52 = vmax.f32 %v515_v50, 0.0 }
 0x13c   : > { %v660_v53 = vpack.c.bf16 %v517_v52, %v516_v51 }
 0x13e   : > { %661 = vst [vmem:[%s205_s12] sm:$0xff] %v660_v53  }
 0x13f   : > { %844 = shalt.err (!%p841_p7)
}
 0x140   : > { %s845_s30 = scalar_lea.hbm %s1064_s22, 128  ;;  %s849_s7 = scalar_lea.hbm %s1113_s4, 256 }
 0x141   : > { %p846_p8 = scmp.ne.s32.totalorder %s1064_s22, %s845_s30  ;;  %p850_p1 = scmp.lt.u32.totalorder %s1064_s22, %s1113_s4 }
 0x142   : > { %p851_p0 = scmp.lt.u32.totalorder %s849_s7, %s845_s30  ;;  %p853_p6 = scmp.lt.u32.totalorder %s845_s30, %s1064_s22 }
 0x143   : > { %p847_p11 = pnand %p846_p8, %p1124_p9 }
 0x144   : > { %p852_p5 = por %p851_p0, %p850_p1 }
 0x145   : > { %p848_p13 = pneg %p847_p11 }
 0x146   : > { %p854_p10 = por %p853_p6, %p852_p5 }
 0x148   : > { %p855_p12 = pnand %p854_p10, %p848_p13 }
 0x14a   : > { %858 = shalt.err (!%p855_p12)
}
 0x14b   : > { %s905_s10 = smov 64   ;;  %s906_s11 = smov 4  }
 0x14c   : > { %733 = dma.vmem_to_hbm [thread:$0]  (%p1124_p9), %s1066_s13, 128, %s1064_s22, %s1068_s23, %s905_s10, %s905_s10, %s906_s11  }
 0x14d PF: > { %p745_p2 = scmp.ge.s32.totalorder %s897_s18, 2  ;;  %s557_s12 = sand.u32 1, %s885_s15  }
 0x14e   : > { %p1125_p3 = scmp.ne.s32.totalorder %s1118_s26, 0  ;;  %s558_s14 = scalar_lea.sflag [#allocation4], %s557_s12 }
 0x150   : > { %p740_p4 = pnand %p745_p2, %p1125_p3 }
 0x152   : > { %880 = dma.done.wait (!%p740_p4), %s558_s14, 128  }
 0x153   : > { %882 = vsyncadd (!%p740_p4), %s558_s14, 4294967168  ;;  %p15_p7 = scmp.ge.s32.totalorder %s957_s21, 4   ;;  %s1126_s15 = smov %s889_s16 }
 0x154   : > { %s1127_s16 = smov %s893_s17  ;;  %s1128_s17 = smov %s968_s24 }
 0x155   : > { %s1129_s18 = smov %s957_s21  ;;  %17 = sbr.rel (!%p15_p7) target bundleno = 4 (0x4), region = 78 }
 0x15c   :  { %563 = vsyncpa [#allocation3], 1 }
 0x15d   :  { %565 = vsyncpa [#allocation3 + $0x1], 1 }
 0x15e   :  { %566 = vsyncpa [#allocation4], 1 }
 0x15f   :  { %568 = vsyncpa [#allocation4 + $0x1], 1 }

</bundles_post_ra>
